<compile_context>
chip_gen: v7x
topology: tpu7x:2x2x1
jax: 0.10.0
libtpu: 0.0.40
codegen_flags: <defaults>
</compile_context>

<pallas_src>
import functools

import jax
import jax.numpy as jnp
from jax.experimental import pallas as pl
from jax.experimental.pallas import tpu as pltpu


def _linear_bn_relu_dropout_kernel(*refs, inv_cnt, eps, keep_threshold):
    """Fused Linear + BatchNorm1d(L) (training-mode stats) + ReLU + Dropout."""
    if keep_threshold is not None:
        (x_ref, w_ref, b_ref, g_ref, bt_ref, m_ref, mt_ref, bits_ref, o_ref) = refs
    else:
        (x_ref, w_ref, b_ref, g_ref, bt_ref, m_ref, mt_ref, o_ref) = refs
        bits_ref = None

    # ---- Linear: y = x @ W + b  (MXU, f32 accumulation) ----
    y = jnp.dot(x_ref[...], w_ref[...],
                preferred_element_type=jnp.float32) + b_ref[...]          # (NL, Dout) f32

    # ---- BatchNorm1d(L) training stats in one elementwise pass ----
    # Per-row lane reductions (XLU), then per-channel sums via tiny indicator matmuls
    # (row i belongs to channel l = i % L); no reshapes of the big tensor.
    row_sum = jnp.sum(y, axis=1, keepdims=True)                           # (NL, 1)
    row_sq = jnp.sum(y * y, axis=1, keepdims=True)                        # (NL, 1)
    ch_sum = jnp.dot(mt_ref[...], row_sum, preferred_element_type=jnp.float32)  # (L, 1)
    ch_sq = jnp.dot(mt_ref[...], row_sq, preferred_element_type=jnp.float32)    # (L, 1)
    mean = ch_sum * inv_cnt                                               # (L, 1)
    var = ch_sq * inv_cnt - mean * mean                                   # biased (training)
    inv_std = jax.lax.rsqrt(var + eps)                                    # (L, 1)

    # gamma/beta arrive pre-scaled by the dropout survivor scale 1/(1-p).
    scale_l = g_ref[...] * inv_std                                        # (L, 1)
    shift_l = bt_ref[...] - mean * scale_l                                # (L, 1)
    # Broadcast channel scale/shift back to rows (tiny matmul, no reshape).
    row_scale = jnp.dot(m_ref[...], scale_l, preferred_element_type=jnp.float32)  # (NL, 1)
    row_shift = jnp.dot(m_ref[...], shift_l, preferred_element_type=jnp.float32)  # (NL, 1)

    # ---- BN affine + ReLU (dropout scale already folded in) ----
    y_out = jnp.maximum(y * row_scale + row_shift, 0.0)

    # ---- Dropout (training): single integer-threshold select ----
    if keep_threshold is not None:
        keep = bits_ref[...] >= jnp.uint32(keep_threshold)
        y_out = jnp.where(keep, y_out, 0.0)

    o_ref[...] = y_out.astype(o_ref.dtype)


def linear_layer_forward(x, w, b, gamma, beta, *, seed, drop_prob, eps=1e-5,
                         mxu_dtype=jnp.float32):
    """Forward pass of Linear_layer (is_1d=True).

    x: (N, L, D_in); w: (D_in, D_out); b: (D_out,); gamma/beta: (L,).
    Returns (N, L, D_out) float32.  mxu_dtype=jnp.bfloat16 is recommended for large shapes
    on v5e/v6e/v7x (MXU is bf16-native); accumulation and all elementwise math stay f32.
    """
    N, L, Din = x.shape
    Dout = w.shape[1]
    NL = N * L
    drop_prob = float(drop_prob)
    if not (0.0 <= drop_prob < 1.0):
        raise ValueError("drop_prob must be in [0, 1)")
    survivor_scale = 1.0 / (1.0 - drop_prob) if drop_prob > 0.0 else 1.0

    # Flatten in the wrapper: big tensors stay 2D inside the kernel.
    x2 = x.reshape(NL, Din).astype(mxu_dtype)
    w2 = w.astype(mxu_dtype)
    b2 = b.reshape(1, Dout).astype(jnp.float32)
    # Fold the dropout survivor scale into gamma/beta (relu(s*a) == s*relu(a), s > 0).
    g2 = (gamma.astype(jnp.float32) * survivor_scale).reshape(L, 1)
    bt2 = (beta.astype(jnp.float32) * survivor_scale).reshape(L, 1)

    # Channel-indicator matrices: flattened row i belongs to BN channel l = i % L.
    l_of_row = jnp.arange(NL, dtype=jnp.int32) % L
    m = (l_of_row[:, None] == jnp.arange(L, dtype=jnp.int32)[None, :]).astype(jnp.float32)
    mt = m.T  # (L, NL)

    args = [x2, w2, b2, g2, bt2, m, mt]
    keep_threshold = None
    if drop_prob > 0.0:
        # keep iff bits >= round(p * 2^32)  =>  P(keep) = 1 - p  (single u32 compare).
        keep_threshold = min((1 << 32) - 1, int(round(drop_prob * float(1 << 32))))
        bits = jax.random.bits(jax.random.PRNGKey(int(seed)), (NL, Dout), dtype=jnp.uint32)
        args.append(bits)

    kernel = functools.partial(
        _linear_bn_relu_dropout_kernel,
        inv_cnt=1.0 / float(N * Dout), eps=float(eps), keep_threshold=keep_threshold)

    vmem = pl.BlockSpec(memory_space=pltpu.MemorySpace.VMEM)
    out2 = pl.pallas_call(
        kernel,
        out_shape=jax.ShapeDtypeStruct((NL, Dout), jnp.float32),
        in_specs=[vmem] * len(args),
        out_specs=vmem,
    )(*args)
    return out2.reshape(N, L, Dout)


def _reference_no_dropout(x, w, b, gamma, beta, eps=1e-5):
    y = jnp.einsum("nld,do->nlo", x, w) + b[None, None, :]
    mean = jnp.mean(y, axis=(0, 2), keepdims=True)
    var = jnp.mean((y - mean) ** 2, axis=(0, 2), keepdims=True)
    y_hat = (y - mean) / jnp.sqrt(var + eps)
    y_bn = y_hat * gamma[None, :, None] + beta[None, :, None]
    return jnp.maximum(y_bn, 0.0)


if __name__ == "__main__":
    # Module config: Linear_layer(seed=0, drop_prob=0.1, input_size=32, output_size=64,
    #                             length=8, is_1d=True); features: (N=2, length=8, 32)
    N, L, Din, Dout = 2, 8, 32, 64
    drop_prob = 0.1

    key = jax.random.PRNGKey(0)
    kx, kw, kb = jax.random.split(key, 3)
    x = jax.random.normal(kx, (N, L, Din), dtype=jnp.float32)
    bound = 1.0 / (Din ** 0.5)
    w = jax.random.uniform(kw, (Din, Dout), jnp.float32, -bound, bound)
    b = jax.random.uniform(kb, (Dout,), jnp.float32, -bound, bound)
    gamma = jnp.ones((L,), jnp.float32)   # BatchNorm weight init
    beta = jnp.zeros((L,), jnp.float32)   # BatchNorm bias init

    # 1) Deterministic check (dropout disabled) against a pure-JAX reference.
    out_p0 = jax.block_until_ready(
        linear_layer_forward(x, w, b, gamma, beta, seed=0, drop_prob=0.0))
    ref_p0 = _reference_no_dropout(x, w, b, gamma, beta)
    assert out_p0.shape == (N, L, Dout)
    # MXU default precision may route f32 operands through bf16 passes -> modest tolerance.
    assert jnp.allclose(out_p0, ref_p0, atol=1e-2, rtol=1e-2), "mismatch vs reference"

    # 2) Training-mode dropout: each element is either 0 (dropped) or the no-dropout
    #    activation scaled by 1/(1-p) (dropout is after BN, so stats are unchanged).
    out = jax.block_until_ready(
        linear_layer_forward(x, w, b, gamma, beta, seed=1234, drop_prob=drop_prob))
    scaled_ref = out_p0 / (1.0 - drop_prob)
    consistent = (jnp.abs(out) < 1e-5) | (jnp.abs(out - scaled_ref) < 1e-3)
    assert bool(jnp.all(consistent)), "dropout output inconsistent with activations"

    # 3) bf16 MXU-operand variant (the recommended setting for large shapes on TPU).
    out_bf16 = jax.block_until_ready(
        linear_layer_forward(x, w, b, gamma, beta, seed=0, drop_prob=0.0,
                             mxu_dtype=jnp.bfloat16))
    assert jnp.allclose(out_bf16, ref_p0, atol=5e-2, rtol=5e-2), "bf16 variant mismatch"

    print("KERNEL_OK")
</pallas_src>

<mosaic_0001>
module attributes {stable_mosaic.version = 11 : i64} {
  func.func @_linear_bn_relu_dropout_kernel(%arg0: memref<16x32xf32, #tpu.memory_space<vmem>>, %arg1: memref<32x64xf32, #tpu.memory_space<vmem>>, %arg2: memref<1x64xf32, #tpu.memory_space<vmem>>, %arg3: memref<8x1xf32, #tpu.memory_space<vmem>>, %arg4: memref<8x1xf32, #tpu.memory_space<vmem>>, %arg5: memref<16x8xf32, #tpu.memory_space<vmem>>, %arg6: memref<8x16xf32, #tpu.memory_space<vmem>>, %arg7: memref<16x64xf32, #tpu.memory_space<vmem>>) attributes {dimension_semantics = [], scalar_prefetch = 0 : i64, scratch_operands = 0 : i64, tpu.core_type = #tpu.core_type<tc>} {
    %c0 = arith.constant 0 : index
    %c0_0 = arith.constant 0 : index
    %0 = vector.load %arg0[%c0, %c0_0] : memref<16x32xf32, #tpu.memory_space<vmem>>, vector<16x32xf32>
    %c0_1 = arith.constant 0 : index
    %c0_2 = arith.constant 0 : index
    %1 = vector.load %arg1[%c0_1, %c0_2] : memref<32x64xf32, #tpu.memory_space<vmem>>, vector<32x64xf32>
    %cst = arith.constant dense<0.000000e+00> : vector<16x64xf32>
    %2 = tpu.matmul %0, %1, %cst {dimension_numbers = #tpu.dot_dimension_numbers<[1], [0], [0], [1], [0, 0, 1, 1], [], []>} : vector<16x32xf32>, vector<32x64xf32>, vector<16x64xf32> -> vector<16x64xf32>
    %c0_3 = arith.constant 0 : index
    %c0_4 = arith.constant 0 : index
    %3 = vector.load %arg2[%c0_3, %c0_4] : memref<1x64xf32, #tpu.memory_space<vmem>>, vector<1x64xf32>
    %4 = vector.broadcast %3 : vector<1x64xf32> to vector<16x64xf32>
    %5 = arith.addf %2, %4 : vector<16x64xf32>
    %cst_5 = arith.constant dense<0.000000e+00> : vector<16xf32>
    %6 = vector.multi_reduction <add>, %5, %cst_5 [1] : vector<16x64xf32> to vector<16xf32>
    %7 = vector.shape_cast %6 : vector<16xf32> to vector<16x1xf32>
    %8 = arith.mulf %5, %5 : vector<16x64xf32>
    %cst_6 = arith.constant dense<0.000000e+00> : vector<16xf32>
    %9 = vector.multi_reduction <add>, %8, %cst_6 [1] : vector<16x64xf32> to vector<16xf32>
    %10 = vector.shape_cast %9 : vector<16xf32> to vector<16x1xf32>
    %c0_7 = arith.constant 0 : index
    %c0_8 = arith.constant 0 : index
    %11 = vector.load %arg6[%c0_7, %c0_8] : memref<8x16xf32, #tpu.memory_space<vmem>>, vector<8x16xf32>
    %cst_9 = arith.constant dense<0.000000e+00> : vector<8x1xf32>
    %12 = tpu.matmul %11, %7, %cst_9 {dimension_numbers = #tpu.dot_dimension_numbers<[1], [0], [0], [1], [0, 0, 1, 1], [], []>} : vector<8x16xf32>, vector<16x1xf32>, vector<8x1xf32> -> vector<8x1xf32>
    %c0_10 = arith.constant 0 : index
    %c0_11 = arith.constant 0 : index
    %13 = vector.load %arg6[%c0_10, %c0_11] : memref<8x16xf32, #tpu.memory_space<vmem>>, vector<8x16xf32>
    %cst_12 = arith.constant dense<0.000000e+00> : vector<8x1xf32>
    %14 = tpu.matmul %13, %10, %cst_12 {dimension_numbers = #tpu.dot_dimension_numbers<[1], [0], [0], [1], [0, 0, 1, 1], [], []>} : vector<8x16xf32>, vector<16x1xf32>, vector<8x1xf32> -> vector<8x1xf32>
    %cst_13 = arith.constant 7.812500e-03 : f32
    %15 = vector.broadcast %cst_13 : f32 to vector<8x1xf32>
    %16 = arith.mulf %12, %15 : vector<8x1xf32>
    %cst_14 = arith.constant 7.812500e-03 : f32
    %17 = vector.broadcast %cst_14 : f32 to vector<8x1xf32>
    %18 = arith.mulf %14, %17 : vector<8x1xf32>
    %19 = arith.mulf %16, %16 : vector<8x1xf32>
    %20 = arith.subf %18, %19 : vector<8x1xf32>
    %cst_15 = arith.constant 9.99999974E-6 : f32
    %21 = vector.broadcast %cst_15 : f32 to vector<8x1xf32>
    %22 = arith.addf %20, %21 : vector<8x1xf32>
    %23 = math.rsqrt %22 : vector<8x1xf32>
    %c0_16 = arith.constant 0 : index
    %c0_17 = arith.constant 0 : index
    %24 = vector.load %arg3[%c0_16, %c0_17] : memref<8x1xf32, #tpu.memory_space<vmem>>, vector<8x1xf32>
    %25 = arith.mulf %24, %23 : vector<8x1xf32>
    %c0_18 = arith.constant 0 : index
    %c0_19 = arith.constant 0 : index
    %26 = vector.load %arg4[%c0_18, %c0_19] : memref<8x1xf32, #tpu.memory_space<vmem>>, vector<8x1xf32>
    %27 = arith.mulf %16, %25 : vector<8x1xf32>
    %28 = arith.subf %26, %27 : vector<8x1xf32>
    %c0_20 = arith.constant 0 : index
    %c0_21 = arith.constant 0 : index
    %29 = vector.load %arg5[%c0_20, %c0_21] : memref<16x8xf32, #tpu.memory_space<vmem>>, vector<16x8xf32>
    %cst_22 = arith.constant dense<0.000000e+00> : vector<16x1xf32>
    %30 = tpu.matmul %29, %25, %cst_22 {dimension_numbers = #tpu.dot_dimension_numbers<[1], [0], [0], [1], [0, 0, 1, 1], [], []>} : vector<16x8xf32>, vector<8x1xf32>, vector<16x1xf32> -> vector<16x1xf32>
    %c0_23 = arith.constant 0 : index
    %c0_24 = arith.constant 0 : index
    %31 = vector.load %arg5[%c0_23, %c0_24] : memref<16x8xf32, #tpu.memory_space<vmem>>, vector<16x8xf32>
    %cst_25 = arith.constant dense<0.000000e+00> : vector<16x1xf32>
    %32 = tpu.matmul %31, %28, %cst_25 {dimension_numbers = #tpu.dot_dimension_numbers<[1], [0], [0], [1], [0, 0, 1, 1], [], []>} : vector<16x8xf32>, vector<8x1xf32>, vector<16x1xf32> -> vector<16x1xf32>
    %33 = vector.broadcast %30 : vector<16x1xf32> to vector<16x64xf32>
    %34 = arith.mulf %5, %33 : vector<16x64xf32>
    %35 = vector.broadcast %32 : vector<16x1xf32> to vector<16x64xf32>
    %36 = arith.addf %34, %35 : vector<16x64xf32>
    %cst_26 = arith.constant 0.000000e+00 : f32
    %37 = vector.broadcast %cst_26 : f32 to vector<16x64xf32>
    %38 = arith.maximumf %36, %37 : vector<16x64xf32>
    %c0_27 = arith.constant 0 : index
    %c0_28 = arith.constant 0 : index
    %39 = vector.load %arg7[%c0_27, %c0_28] : memref<16x64xf32, #tpu.memory_space<vmem>>, vector<16x64xf32>
    tpu.vector_store %arg7[%c0_27, %c0_28], %38 {strides = array<i32>} : memref<16x64xf32, #tpu.memory_space<vmem>>, vector<16x64xf32>,
    return
  }
}

</mosaic_0001>

<bundles_post_ra>
// kernel: tpu_custom_call.1
= control target key start
LH: loop header
LB: loop body
LE: loop exit
PB: predicated region body
PF: predicated region fallthrough
CT: control target
= control target key end

     0   :  { %12 = vsyncpa [#allocation3], 0  ;;  %s777_s0 = inlined_call_operand.hbm [shape: f32[16,32], index: 0, kind: input, shape index: {}]   ;;  %s778_s1 = inlined_call_operand.vmem [shape: f32[32,64], index: 1, kind: input, shape index: {}]   ;;  %s779_s2 = inlined_call_operand.vmem [shape: f32[1,64], index: 2, kind: input, shape index: {}]   ;;  %s780_s3 = inlined_call_operand.vmem [shape: f32[8,1], index: 3, kind: input, shape index: {}]   ;;  %s781_s4 = inlined_call_operand.vmem [shape: f32[8,1], index: 4, kind: input, shape index: {}]   ;;  %s782_s5 = inlined_call_operand.vmem [shape: f32[16,8], index: 5, kind: input, shape index: {}]   ;;  %s783_s6 = inlined_call_operand.vmem [shape: f32[8,16], index: 6, kind: input, shape index: {}]   ;;  %s784_s7 = inlined_call_operand.hbm [shape: f32[16,64], index: 7, kind: output, shape index: {}]  }
   0x1   :  { %13 = vsyncpa [#allocation4], 0  ;;  %s647_s24 = smov [#allocation2]   ;;  %s599_s28 = scalar_lea.hbm %s777_s0, 256 }
   0x2   :  { %s19_s25 = sshll.u32 %s647_s24, 4  ;;  %p600_p0 = scmp.ne.s32.totalorder %s777_s0, %s599_s28  ;;  %s20_s25 = int_to_ptr.vmem [resolvable:$true] %s19_s25 }
   0x3   :  { %p603_p1 = scmp.lt.u32.totalorder %s599_s28, %s777_s0 }
   0x5   :  { %p605_p2 = pnand %p603_p1, %p600_p0 }
   0x7   :  { %608 = shalt.err (!%p605_p2)
}
   0x8   :  { %s609_s10 = scalar_lea.vmem %s20_s25, 256  ;;  %p614_p4 = scmp.lt.s32.totalorder %s20_s25, %s20_s25 }
   0x9   :  { %p610_p3 = scmp.ne.s32.totalorder %s20_s25, %s609_s10  ;;  %p615_p5 = scmp.lt.s32.totalorder %s609_s10, %s609_s10 }
   0xb   :  { %p616_p6 = por %p615_p5, %p614_p4 }
   0xd   :  { %p617_p7 = pnand %p616_p6, %p610_p3 }
   0xf   :  { %620 = shalt.err (!%p617_p7)
}
  0x10   :  { %s648_s11 = smov 128   ;;  %s649_s12 = smov 8  }
  0x11   :  { %25 = dma.hbm_to_vmem [thread:$0]  %s777_s0, 256, %s20_s25, [#allocation3], %s648_s11, %s648_s11, %s649_s12  }
  0x12   :  { %643 = dma.done.wait [#allocation3], 256  }
  0x13   :  { %644 = vsyncadd [#allocation3], 4294967040  ;;  %vm54_vm0 = vcmask 261120   ;;  %v43_v0 = vld [vmem:[%s778_s1] sm:$0xff]  ;;  %v44_v1 = vld [vmem:[%s778_s1 + $0x8] sm:$0xff]  ;;  %vm136_vm1 = vcmask 523264  }
  0x14   :  { %v45_v2 = vld [vmem:[%s778_s1 + $0x10] sm:$0xff]  ;;  %v573_v3 = vpack.c.bf16 %v44_v1, %v43_v0  ;;  %v46_v4 = vld [vmem:[%s778_s1 + $0x18] sm:$0xff]  ;;  %v41_v5 = vld [vmem:[#allocation2] sm:$0xff]  ;;  %v650_v19 = vmov 0.0|0.0   ;;  %vm651_vm2 = vmmov 0   ;;  %v652_v20 = vmov 0.0  }
  0x15   :  { %v577_v6 = vpack.c.bf16 %v46_v4, %v45_v2  ;;  %546 = vmatprep.mubr.msk.f32.mxu0 %vm54_vm0, %v41_v5  ;;  %v42_v7 = vld [vmem:[#allocation2 + $0x8] sm:$0xff]  ;;  %v511_v8 = vld [vmem:[%s779_s2] ss:$0 sm:$0xff]  ;;  %581 = vmatprep.subr.bf16.mxu1 %v650_v19  ;;  %vm152_vm3 = vcmask 130048   ;;  %vm309_vm4 = vcmask 64512   ;;  %v653_v29 = vmov 0  }
  0x16   :  { %574 = vmatprep.subr.bf16.mxu0 %v573_v3  ;;  %553 = vmatprep.mubr.msk.f32.mxu1 %vm651_vm2, %v652_v20  ;;  %v151_v26 = vld [vmem:[%s783_s6] sm:$0xff]  ;;  %v308_v42 = vld [vmem:[%s782_s5 + $0x8] sm:$0xff] }
  0x17   :  { %576 = vmatpush3.bf16.msra.mxu0 %v573_v3  ;;  %v307_v28 = vld [vmem:[%s782_s5] sm:$0xff]  ;;  %596 = vset.pattern.permute.xlu1 %v653_v29 }
  0x18   :  { %578 = vmatprep.subr.bf16.mxu0 %v577_v6  ;;  %595 = vset.pattern.permute.xlu0 %v653_v29  ;;  %v302_v39 = vld [vmem:[%s780_s3] sm:$0xff]  ;;  %s654_s3 = smov [#allocation5]  }
  0x19   :  { %v304_v43 = vld [vmem:[%s781_s4] sm:$0xff]  ;;  %s499_s4 = sshll.u32 %s654_s3, 4  ;;  %s500_s4 = int_to_ptr.vmem [resolvable:$true] %s499_s4 }
  0x1a   :  { %s621_s5 = scalar_lea.vmem %s500_s4, 256  ;;  %p626_p9 = scmp.lt.s32.totalorder %s500_s4, %s500_s4 }
  0x1b   :  { %580 = vmatpush3.bf16.msra.mxu0 %v577_v6  ;;  %p622_p8 = scmp.ne.s32.totalorder %s500_s4, %s621_s5  ;;  %p627_p10 = scmp.lt.s32.totalorder %s621_s5, %s621_s5 }
  0x1d   :  { %p628_p11 = por %p627_p10, %p626_p9 }
  0x1e   :  { %547 = vmatmul.mubr.msk.f32.vlgmr.msra.gmra.mrb[0].mxu0 %vm54_vm0, %v42_v7 }
  0x1f   :  { %565 = vmatprep.mubr.msk.f32.mxu0 %vm309_vm4, %v307_v28  ;;  %p629_p12 = pnand %p628_p11, %p622_p8 }
  0xf1   :  { %v548_v9 = vpop.f32.mrb[0].mxu0 }
  0xf2   :  { %v127_v10 = vpop.f32.mrb[1].mxu0  ;;  %v725_v11 = vadd.f32 %v548_v9, %v511_v8 }
  0xf3   :  { %v727_v12 = vadd.f32 %v511_v8, %v127_v10 }
  0xf4   :  { %v144_v16 = vmul.f32 %v725_v11, %v725_v11  ;;  %v140_v17 = vsel %vm136_vm1, %v725_v11, 0.0 }
  0xf5   :  { %v137_v13 = vsel %vm136_vm1, %v727_v12, 0.0  ;;  %v143_v14 = vmul.f32 %v727_v12, %v727_v12 }
  0xf6   :  { %138 = vadd.xlane.f32.xlu0 %v137_v13  ;;  %v148_v18 = vsel %vm136_vm1, %v144_v16, 0.0 }
  0xf7   :  { %v145_v15 = vsel %vm136_vm1, %v143_v14, 0.0 }
  0xf8   :  { %146 = vadd.xlane.f32.xlu1 %v145_v15 }
  0xfa   :  { %141 = vadd.xlane.f32.xlu0 %v140_v17 }
  0xfc   :  { %149 = vadd.xlane.f32.xlu1 %v148_v18 }
 0x183   :  { %v139_v21 = vpop.xlane.xlu0 %138 }
 0x185   :  { %v147_v22 = vpop.xlane.xlu1 %146 }
 0x187   :  { %v142_v23 = vpop.xlane.xlu0 %141 }
 0x188   :  { %v582_v24 = vpack.c.bf16 %v142_v23, %v139_v21 }
 0x189   :  { %v150_v25 = vpop.xlane.xlu1 %149 }
 0x18a   :  { %583 = vmatpush3.bf16.msra.mxu1 %v582_v24  ;;  %v585_v27 = vpack.c.bf16 %v150_v25, %v147_v22 }
 0x18b   :  { %584 = vmatprep.subr.bf16.mxu1 %v650_v19 }
 0x18d   :  { %554 = vmatmul.mubr.msk.f32.vlgmr.msra.gmra.mrb[0].mxu1 %vm152_vm3, %v151_v26 }
 0x18e   :  { %586 = vmatpush3.bf16.msra.mxu1 %v585_v27  ;;  %560 = vmatprep.mubr.msk.f32.mxu1 %vm651_vm2, %v652_v20 }
 0x191   :  { %561 = vmatmul.mubr.msk.f32.vlgmr.msra.gmra.mrb[2].mxu1 %vm152_vm3, %v151_v26 }
 0x192   :  { %570 = vmatprep.mubr.msk.f32.mxu1 %vm309_vm4, %v307_v28 }
 0x260   :  { %v222_v30 = vpop.f32.mrb[0].mxu1 }
 0x261   :  { %v296_v31 = vmul.f32 0.0078125, %v222_v30  ;;  %v555_v32 = vpop.f32.mrb[1].mxu1 }
 0x263   :  { %v298_v34 = vmul.f32 %v296_v31, %v296_v31 }
 0x264   :  { %v292_v33 = vpop.f32.mrb[2].mxu1 }
 0x265   :  { %v297_v35 = vmul.f32 0.0078125, %v292_v33  ;;  %v562_v36 = vpop.f32.mrb[3].mxu1 }
 0x267   :  { %v299_v37 = vsub.f32 %v297_v35, %v298_v34 }
 0x269   :  { %v300_v38 = vadd.f32 1e-05, %v299_v37 }
 0x26b   :  { %597 = vrsqrt.f32 %v300_v38 }
 0x275   :  { %v598_v40 = vpop.eup %597 }
 0x276   :  { %v303_v41 = vmul.f32 %v598_v40, %v302_v39 }
 0x278   :  { %563 = vmatprep.subr.mxu0 %v303_v41  ;;  %v305_v44 = vmul.f32 %v303_v41, %v296_v31 }
 0x279   :  { %564 = vmatpush3.msra.mxu0 %v303_v41 }
 0x27a   :  { %566 = vmatmul.mubr.msk.f32.vlgmr.msra.gmra.mrb[2].mxu0 %vm309_vm4, %v308_v42  ;;  %v306_v45 = vsub.f32 %v304_v43, %v305_v44 }
 0x27c   :  { %568 = vmatprep.subr.mxu1 %v306_v45 }
 0x27d   :  { %569 = vmatpush3.msra.mxu1 %v306_v45 }
 0x27e   :  { %571 = vmatmul.mubr.msk.f32.vlgmr.msra.gmra.mrb[4].mxu1 %vm309_vm4, %v308_v42 }
 0x34d   :  { %v567_v46 = vpop.f32.mrb[2].mxu0 }
 0x34e   :  { %473 = vperm.xlu1 %596, %v567_v46   ;;  %v382_v47 = vpop.f32.mrb[3].mxu0 }
 0x34f   :  { %468 = vperm.xlu0 %595, %v382_v47  }
 0x351   :  { %v572_v48 = vpop.f32.mrb[4].mxu1 }
 0x352   :  { %v457_v49 = vpop.f32.mrb[5].mxu1 }
 0x353   :  { %480 = vperm.xlu1 %596, %v457_v49  }
 0x357   :  { %485 = vperm.xlu1 %596, %v572_v48  }
 0x3cd   :  { %v474_v50 = vpop.permute.xlu1 %473 }
 0x3ce   :  { %v469_v51 = vpop.permute.xlu0 %468  ;;  %v477_v55 = vmul.f32 %v474_v50, %v725_v11 }
 0x3cf   :  { %v476_v52 = vmul.f32 %v469_v51, %v727_v12 }
 0x3d2   :  { %v481_v53 = vpop.permute.xlu1 %480 }
 0x3d3   :  { %v488_v54 = vadd.f32 %v481_v53, %v476_v52 }
 0x3d5   :  { %v490_v56 = vmax.f32 %v488_v54, 0.0 }
 0x3d6   :  { %v486_v57 = vpop.permute.xlu1 %485 }
 0x3d7   :  { %492 = vst.msk [vmem:[#allocation5] sm:$0xff] %vm136_vm1, %v490_v56  ;;  %v489_v58 = vadd.f32 %v486_v57, %v477_v55 }
 0x3d9   :  { %v491_v59 = vmax.f32 %v489_v58, 0.0 }
 0x3db   :  { %493 = vst.msk [vmem:[#allocation5 + $0x8] sm:$0xff] %vm136_vm1, %v491_v59 }
 0x3dc   :  { %632 = shalt.err (!%p629_p12)
}
 0x3dd   :  { %s633_s10 = scalar_lea.hbm %s784_s7, 256 }
 0x3de   :  { %p634_p13 = scmp.ne.s32.totalorder %s784_s7, %s633_s10  ;;  %p637_p0 = scmp.lt.u32.totalorder %s633_s10, %s784_s7 }
 0x3e0   :  { %p639_p1 = pnand %p637_p0, %p634_p13 }
 0x3e2   :  { %642 = shalt.err (!%p639_p1)
}
 0x3e3   :  { %505 = dma.vmem_to_hbm [thread:$0]  %s500_s4, 256, %s784_s7, [#allocation4], %s648_s11, %s648_s11, %s649_s12  }
 0x3e4   :  { %645 = dma.done.wait [#allocation4], 256  }
 0x3e5   :  { %646 = vsyncadd [#allocation4], 4294967040 }
 0x3e6   :  { %509 = vsyncpa [#allocation3], 1 }
 0x3e7   :  { %510 = vsyncpa [#allocation4], 1 }

</bundles_post_ra>
